<compile_context>
chip_gen: v7x
topology: tpu7x:2x2x1
jax: 0.10.0
libtpu: 0.0.40
codegen_flags: <defaults>
</compile_context>

<pallas_src>
import numpy as np
import jax
import jax.numpy as jnp
from jax.experimental import pallas as pl
from jax.experimental.pallas import tpu as pltpu


def sinusoid_encoding_table(n_position, d_hid, dtype=jnp.float32):
    """Same construction as the PyTorch module (numpy, host-side constant)."""
    position = np.arange(n_position, dtype=np.float64)[:, None]
    hid = np.arange(d_hid, dtype=np.float64)[None, :]
    angle = position / np.power(10000.0, 2.0 * (hid // 2) / float(d_hid))
    table = np.zeros((n_position, d_hid), dtype=np.float64)
    table[:, 0::2] = np.sin(angle[:, 0::2])
    table[:, 1::2] = np.cos(angle[:, 1::2])
    return jnp.asarray(table, dtype=dtype)


def _posenc_kernel(rank_ref, x_ref, pt_ref, o_ref):
    # rank_ref: (R, 1) int32 | x_ref: (R, D) | pt_ref: (P, D) | o_ref: (R, D)
    R = x_ref.shape[0]
    P = pt_ref.shape[0]

    idx = rank_ref[...]                                     # (R, 1)
    pos = jax.lax.broadcasted_iota(jnp.int32, (R, P), 1)    # (R, P)
    table = pt_ref[...]
    onehot = (pos == idx).astype(table.dtype)               # 0/1 exact in any dtype

    # Row gather as a matmul on the MXU: (R, P) @ (P, D) -> (R, D), f32 acc.
    pe = jnp.dot(onehot, table, preferred_element_type=jnp.float32)

    o_ref[...] = (x_ref[...].astype(jnp.float32) + pe).astype(o_ref.dtype)


def _choose_block_rows(n_rows, max_rows):
    """Largest multiple-of-8 row block <= max_rows that (a) divides n_rows if
    possible (no ragged tail -> no pad/slice, no masked last block) and
    (b) leaves >= 2 grid steps so the 'parallel' axis uses both v7x cores."""
    if n_rows <= 8:
        return n_rows                      # full-array block is always legal
    max_rows = max(8, (max_rows // 8) * 8)
    cap = min(max_rows, max(8, ((n_rows // 2) // 8) * 8))
    for r in range(cap, 7, -8):
        if n_rows % r == 0:
            return r
    return cap                             # ragged tail: Pallas masks last block


def positional_encoding(enc_input, ranking, pos_table, *, block_rows=1024):
    """enc_input: [B, S, D], ranking: [B, S] int, pos_table: [P, D].

    Returns enc_input + pos_table[ranking]  (shape [B, S, D]).
    NOTE: on v5e (16 MiB default scoped VMEM) pass block_rows<=512.
    """
    B, S, D = enc_input.shape
    P = pos_table.shape[0]
    N = B * S

    # bf16 activations: keep the table (and one-hot) in bf16 — exact for the
    # one-hot, halves the dot-operand traffic, output is bf16 anyway.
    if enc_input.dtype == jnp.bfloat16:
        pos_table = pos_table.astype(jnp.bfloat16)

    x = enc_input.reshape(N, D)                       # free metadata reshape
    r = ranking.reshape(N, 1).astype(jnp.int32)

    def _vmem_estimate(rows):
        # double-buffered x / out / rank blocks + resident table
        # + (rows, P) one-hot and (rows, D) f32 temporaries
        return (2 * rows * D * (x.dtype.itemsize + enc_input.dtype.itemsize)
                + 2 * rows * 4
                + P * D * pos_table.dtype.itemsize
                + rows * P * 4
                + rows * D * 4)

    R = _choose_block_rows(N, block_rows)
    while R > 8 and _vmem_estimate(R) > (48 << 20):   # stay under v7x's 64 MiB
        R = max(8, ((R // 2) // 8) * 8)
    grid = (pl.cdiv(N, R),)
    vmem_limit = int(min(64 << 20, max(32 << 20, 2 * _vmem_estimate(R))))

    # The table block never changes across the grid; single-buffer it when it
    # is big enough for the saved VMEM copy to matter (v7x: only 64 MiB VMEM).
    table_bytes = P * D * pos_table.dtype.itemsize
    if table_bytes >= (1 << 20):
        table_spec = pl.BlockSpec((P, D), lambda i: (0, 0),
                                  pipeline_mode=pl.Buffered(1))
    else:
        table_spec = pl.BlockSpec((P, D), lambda i: (0, 0))

    out = pl.pallas_call(
        _posenc_kernel,
        out_shape=jax.ShapeDtypeStruct((N, D), enc_input.dtype),
        grid_spec=pltpu.PrefetchScalarGridSpec(
            num_scalar_prefetch=0,
            grid=grid,
            in_specs=[
                pl.BlockSpec((R, 1), lambda i: (i, 0)),   # ranking rows
                pl.BlockSpec((R, D), lambda i: (i, 0)),   # enc_input rows
                table_spec,                               # full table, VMEM-resident
            ],
            out_specs=pl.BlockSpec((R, D), lambda i: (i, 0)),
        ),
        compiler_params=pltpu.CompilerParams(
            dimension_semantics=("parallel",),
            vmem_limit_bytes=vmem_limit),
    )(r, x, pos_table)

    return out.reshape(B, S, D)


def _reference(enc_input, ranking, pos_table):
    return enc_input + pos_table[ranking]


if __name__ == "__main__":
    # Small shapes consistent with the module: batch=2, seq=8, d_hid=32,
    # n_position=40 (module default).
    B, S, D, P = 2, 8, 32, 40

    key = jax.random.PRNGKey(0)
    kx, kr = jax.random.split(key)
    enc_input = jax.random.normal(kx, (B, S, D), dtype=jnp.float32)
    ranking = jax.random.randint(kr, (B, S), 0, P, dtype=jnp.int32)

    pos_table = sinusoid_encoding_table(P, D, dtype=jnp.float32)

    out = positional_encoding(enc_input, ranking, pos_table)
    out = jax.block_until_ready(out)

    ref = _reference(enc_input, ranking, pos_table)
    assert out.shape == (B, S, D)
    assert jnp.allclose(out, ref, atol=1e-5, rtol=1e-5)

    print("KERNEL_OK")
</pallas_src>

<mosaic_0001>
module attributes {stable_mosaic.version = 11 : i64} {
  func.func @_posenc_kernel(%arg0: i32, %arg1: memref<8x1xi32, #tpu.memory_space<vmem>>, %arg2: memref<8x32xf32, #tpu.memory_space<vmem>>, %arg3: memref<40x32xf32, #tpu.memory_space<vmem>>, %arg4: memref<8x32xf32, #tpu.memory_space<vmem>>) attributes {dimension_semantics = [#tpu.dimension_semantics<parallel>], iteration_bounds = array<i64: 2>, scalar_prefetch = 0 : i64, scratch_operands = 0 : i64, tpu.core_type = #tpu.core_type<tc>, window_params = [{transform_indices = @transform_0, window_bounds = array<i64: 8, 1>}, {transform_indices = @transform_1, window_bounds = array<i64: 8, 32>}, {pipeline_mode = #tpu.pipeline_mode<synchronous>, transform_indices = @transform_2, window_bounds = array<i64: 40, 32>}, {transform_indices = @transform_3, window_bounds = array<i64: 8, 32>}]} {
    %c0 = arith.constant 0 : index
    %c0_0 = arith.constant 0 : index
    %0 = vector.load %arg1[%c0, %c0_0] : memref<8x1xi32, #tpu.memory_space<vmem>>, vector<8x1xi32>
    %1 = tpu.iota {dimensions = array<i32: 1>} : vector<8x40xi32>
    %c0_1 = arith.constant 0 : index
    %c0_2 = arith.constant 0 : index
    %2 = vector.load %arg3[%c0_1, %c0_2] : memref<40x32xf32, #tpu.memory_space<vmem>>, vector<40x32xf32>
    %3 = vector.broadcast %0 : vector<8x1xi32> to vector<8x40xi32>
    %4 = arith.cmpi eq, %1, %3 : vector<8x40xi32>
    %5 = arith.extui %4 : vector<8x40xi1> to vector<8x40xi32>
    %6 = arith.sitofp %5 : vector<8x40xi32> to vector<8x40xf32>
    %cst = arith.constant dense<0.000000e+00> : vector<8x32xf32>
    %7 = tpu.matmul %6, %2, %cst {dimension_numbers = #tpu.dot_dimension_numbers<[1], [0], [0], [1], [0, 0, 1, 1], [], []>} : vector<8x40xf32>, vector<40x32xf32>, vector<8x32xf32> -> vector<8x32xf32>
    %c0_3 = arith.constant 0 : index
    %c0_4 = arith.constant 0 : index
    %8 = vector.load %arg2[%c0_3, %c0_4] : memref<8x32xf32, #tpu.memory_space<vmem>>, vector<8x32xf32>
    %9 = arith.addf %8, %7 : vector<8x32xf32>
    %c0_5 = arith.constant 0 : index
    %c0_6 = arith.constant 0 : index
    %10 = vector.load %arg4[%c0_5, %c0_6] : memref<8x32xf32, #tpu.memory_space<vmem>>, vector<8x32xf32>
    tpu.vector_store %arg4[%c0_5, %c0_6], %9 {strides = array<i32>} : memref<8x32xf32, #tpu.memory_space<vmem>>, vector<8x32xf32>,
    return
  }
  func.func @transform_0(%arg0: i32) -> (i32, i32) {
    %c0_i32 = arith.constant 0 : i32
    %c0_i32_0 = arith.constant 0 : i32
    return %arg0, %c0_i32 : i32, i32
  }
  func.func @transform_1(%arg0: i32) -> (i32, i32) {
    %c0_i32 = arith.constant 0 : i32
    %c0_i32_0 = arith.constant 0 : i32
    return %arg0, %c0_i32 : i32, i32
  }
  func.func @transform_2(%arg0: i32) -> (i32, i32) {
    %c0_i32 = arith.constant 0 : i32
    %c0_i32_0 = arith.constant 0 : i32
    %c0_i32_1 = arith.constant 0 : i32
    return %c0_i32, %c0_i32_0 : i32, i32
  }
  func.func @transform_3(%arg0: i32) -> (i32, i32) {
    %c0_i32 = arith.constant 0 : i32
    %c0_i32_0 = arith.constant 0 : i32
    return %arg0, %c0_i32 : i32, i32
  }
}

</mosaic_0001>

<bundles_post_ra>
// kernel: tpu_custom_call.1
= control target key start
LH: loop header
LB: loop body
LE: loop exit
PB: predicated region body
PF: predicated region fallthrough
CT: control target
= control target key end

     0   :  { %8 = vsyncpa [#allocation3], 0  ;;  %s649_s0 = inlined_call_operand.vmem [shape: s32[16,1], index: 0, kind: input, shape index: {}]   ;;  %s650_s1 = inlined_call_operand.vmem [shape: f32[16,32], index: 1, kind: input, shape index: {}]   ;;  %s651_s2 = inlined_call_operand.vmem [shape: f32[40,32], index: 2, kind: input, shape index: {}]   ;;  %s652_s3 = inlined_call_operand.hbm [shape: f32[16,32], index: 3, kind: output, shape index: {}]  }
   0x1   :  { %10 = vsyncpa [#allocation3 + $0x1], 0  ;;  %s531_s12 = smov 0   ;;  %s533_s13 = smov 0  }
   0x2   :  { %s535_s14 = smov 0   ;;  %s537_s15 = smov 0  }
   0x3 LB: > { %s552_s16 = sadd.s32 4294967295, %s504_s15   ;;  %s360_s17 = sadd.s32 4294967294, %s504_s15   ;;  %s504_s15 = sphi %s537_s15, %s658_s15   ;;  %s500_s14 = sphi %s535_s14, %s657_s14   ;;  %s496_s13 = sphi %s533_s13, %s656_s13   ;;  %s492_s12 = sphi %s531_s12, %s655_s12  }
   0x4   : > { %s556_s18 = sadd.s32 1, %s504_s15   ;;  %s96_s19 = sadd.s32 1, %s500_s14 }
   0x5   : > { %s93_s20 = ssub.s32 %s504_s15, %s556_s18  ;;  %p106_p0 = scmp.ne.s32.totalorder %s500_s14, %s496_s13 }
   0x6   : > { %p94_p1 = scmp.eq.s32.totalorder %s93_s20, 0  ;;  %p107_p2 = scmp.eq.s32.totalorder %s552_s16, 1 }
   0x7   : > { %p112_p3 = scmp.ne.s32.totalorder %s496_s13, %s492_s12  ;;  %p113_p4 = scmp.eq.s32.totalorder %s360_s17, 1 }
   0x8   : > { %s567_s21 = scalar_select %p94_p1, %s500_s14, %s96_s19  }
   0x9   : > { %p569_p5 = por %p107_p2, %p106_p0  ;;  %p573_p6 = por %p113_p4, %p112_p3 }
   0xa   : > { %p363_p7 = scmp.ge.s32.totalorder %s504_s15, 1  ;;  %p148_p8 = scmp.lt.s32.totalorder %s504_s15, 3 }
   0xc   : > { %p149_p9 = pnand %p363_p7, %p148_p8 }
   0xd   : > { %p175_p10 = scmp.lt.s32.totalorder (!%p149_p9), %s552_s16, 1  ;;  %v186_v0 = vld [vmem:[%s651_s2] sm:$0xff] (!%p149_p9)  ;;  %v187_v1 = vld [vmem:[%s651_s2 + $0x8] sm:$0xff] (!%p149_p9)  ;;  %v188_v2 = vld [vmem:[%s651_s2 + $0x10] sm:$0xff] (!%p149_p9)  ;;  %v506_v3 = vmov (!%p149_p9), 0   ;;  %v507_v4 = vmov (!%p149_p9), 0.0|0.0   ;;  %v184_v11 = vlaneseq (!%p149_p9) }
   0xe   : > { %152 = sbr.rel (%p149_p9) target bundleno = 384 (0x180), region = 32  ;;  %441 = vset.pattern.permute.xlu0 (!%p149_p9), %v506_v3  ;;  %392 = vmatprep.subr.bf16.mxu0 (!%p149_p9), %v507_v4  ;;  %v393_v5 = vpack.c.bf16 (!%p149_p9), %v187_v1, %v186_v0  ;;  %v189_v6 = vld [vmem:[%s651_s2 + $0x18] sm:$0xff] (!%p149_p9)  ;;  %v508_v9 = vmov (!%p149_p9), 0.0   ;;  %v190_v10 = vld [vmem:[%s651_s2 + $0x20] sm:$0xff] (!%p149_p9)  ;;  %vm509_vm0 = vmmov (!%p149_p9), 0   ;;  %vm197_vm1 = vcmask (!%p149_p9), 326656  }
   0xf   : > { %v396_v7 = vpack.c.bf16 (!%p149_p9), %v189_v6, %v188_v2  ;;  %389 = vmatprep.mubr.msk.f32.mxu0 (!%p149_p9), %vm509_vm0, %v508_v9  ;;  %v185_v12 = vand.u32 (!%p149_p9), 127, %v184_v11  ;;  %s172_s17 = sand.u32 (!%p149_p9), 1, %s496_s13   ;;  %s370_s26 = sshll.u32 (!%p149_p9), %s552_s16, 7  ;;  %vm273_vm3 = vcmask (!%p149_p9), 261120  }
  0x10   : > { %394 = vmatpush3.bf16.msra.mxu0 (!%p149_p9), %v393_v5  ;;  %s364_s19 = sshll.u32 (!%p149_p9), %s172_s17, 3  ;;  %s607_s4 = scalar_lea.hbm (!%p149_p9), %s652_s3, %s370_s26 }
  0x11   : > { %395 = vmatprep.subr.bf16.mxu0 (!%p149_p9), %v507_v4  ;;  %s174_s27 = scalar_lea.vmem (!%p149_p9), [#allocation2], %s364_s19 }
  0x12   : > { %s289_s28 = sshll.u32 (!%p149_p9), %s174_s27, 4  ;;  %s609_s28 = int_to_ptr.vmem [resolvable:$true] %s289_s28 }
  0x14   : > { %397 = vmatpush3.bf16.msra.mxu0 (!%p149_p9), %v396_v7 }
  0x15   : > { %s176_s5 = scalar_select %p175_p10, %s552_s16, 1  ;;  %387 = vmatprep.subr.mxu0 %v508_v9 }
  0x16   : > { %s510_s16 = smov [#allocation2]  }
  0x17   : > { %s365_s6 = sshll.u32 %s176_s5, 3  ;;  %s276_s5 = scalar_lea.sflag [#allocation3], %s172_s17 }
  0x18   : > { %s178_s9 = scalar_lea.vmem %s649_s0, %s365_s6  ;;  %388 = vmatpush3.msra.mxu0 %v190_v10  ;;  %s182_s25 = scalar_lea.vmem %s650_s1, %s365_s6 }
  0x19   : > { %v183_v8 = vld [vmem:[%s178_s9] sm:$0xff]  ;;  %s442_s6 = scalar_lea.vmem %s609_s28, 128  ;;  %s446_s7 = sshll.u32 %s510_s16, 4  ;;  %s447_s7 = int_to_ptr.vmem [resolvable:$false] %s446_s7 }
  0x1a   : > { %192 = vperm.xlu0 %441, %v183_v8   ;;  %v271_v15 = vld [vmem:[%s182_s25] sm:$0xff]  ;;  %p443_p11 = scmp.ne.s32.totalorder %s609_s28, %s442_s6  ;;  %s448_s8 = scalar_lea.vmem %s447_s7, 256 }
  0x1b   : > { %p449_p0 = scmp.lt.s32.totalorder %s609_s28, %s447_s7  ;;  %p450_p1 = scmp.lt.s32.totalorder %s448_s8, %s442_s6 }
  0x1c   : > { %p444_p12 = pnand %p443_p11, %p569_p5 }
  0x1d   : > { %p451_p2 = por %p450_p1, %p449_p0 }
  0x1e   : > { %p445_p13 = pneg %p444_p12 }
  0x20   : > { %p452_p3 = pnand %p451_p2, %p445_p13 }
  0x99   : > { %v193_v13 = vpop.permute.xlu0 %192 }
  0x9a   : > { %vm194_vm2 = vcmp.eq.s32.totalorder %v185_v12, %v193_v13 }
  0x9b   : > { %v367_v14 = vsel %vm194_vm2, 1.0, %v508_v9 }
  0x9c   : > { %390 = vmatmul.mubr.msk.f32.vlgmr.msra.gmra.mrb[0].mxu0 %vm197_vm1, %v367_v14 }
 0x16f   : > { %v267_v16 = vpop.f32.mrb[0].mxu0 }
 0x170   : > { %v272_v17 = vadd.f32 %v271_v15, %v267_v16  ;;  %v391_v18 = vpop.f32.mrb[1].mxu0 }
 0x172   : > { %274 = vst.msk [vmem:[%s174_s27] sm:$0xff] %vm273_vm3, %v272_v17 }
 0x173   : > { %455 = shalt.err (!%p452_p3)
}
 0x174   : > { %s456_s9 = scalar_lea.hbm %s607_s4, 128  ;;  %s460_s17 = scalar_lea.hbm %s652_s3, 256 }
 0x175   : > { %p457_p4 = scmp.ne.s32.totalorder %s607_s4, %s456_s9  ;;  %p461_p9 = scmp.lt.u32.totalorder %s607_s4, %s652_s3 }
 0x176   : > { %p462_p10 = scmp.lt.u32.totalorder %s460_s17, %s456_s9  ;;  %p464_p12 = scmp.lt.u32.totalorder %s456_s9, %s607_s4 }
 0x177   : > { %p458_p7 = pnand %p457_p4, %p569_p5 }
 0x178   : > { %p463_p11 = por %p462_p10, %p461_p9 }
 0x179   : > { %p459_p8 = pneg %p458_p7 }
 0x17a   : > { %p465_p13 = por %p464_p12, %p463_p11 }
 0x17c   : > { %p466_p0 = pnand %p465_p13, %p459_p8 }
 0x17e   : > { %469 = shalt.err (!%p466_p0)
}
 0x17f   : > { %398 = dma.vmem_to_hbm [thread:$0]  (%p569_p5), %s609_s28, 128, %s607_s4, %s276_s5  }
 0x180 PF: > { %p404_p1 = scmp.ge.s32.totalorder %s504_s15, 2  ;;  %s301_s24 = sand.u32 1, %s492_s12  }
 0x181   : > { %s302_s25 = scalar_lea.sflag [#allocation3], %s301_s24 }
 0x182   : > { %p401_p2 = pnand %p404_p1, %p573_p6 }
 0x184   : > { %487 = dma.done.wait (!%p401_p2), %s302_s25, 128  }
 0x185   : > { %489 = vsyncadd (!%p401_p2), %s302_s25, 4294967168  ;;  %p13_p3 = scmp.ge.s32.totalorder %s556_s18, 4   ;;  %s655_s12 = smov %s496_s13 }
 0x186   : > { %s656_s13 = smov %s500_s14  ;;  %s657_s14 = smov %s567_s21 }
 0x187   : > { %s658_s15 = smov %s556_s18  ;;  %15 = sbr.rel (!%p13_p3) target bundleno = 3 (0x3), region = 70 }
 0x18e   :  { %307 = vsyncpa [#allocation3], 1 }
 0x18f   :  { %309 = vsyncpa [#allocation3 + $0x1], 1 }

</bundles_post_ra>
